<compile_context>
chip_gen: v6e
topology: v6e:2x2x1
jax: 0.10.0
libtpu: 0.0.40
codegen_flags: <defaults>
</compile_context>

<pallas_src>
import jax
import jax.numpy as jnp
from jax.experimental import pallas as pl
from jax.experimental.pallas import tpu as pltpu


# ---------------------------------------------------------------------------
# Trace-time helpers
# ---------------------------------------------------------------------------
def _round_up(x, m):
    return ((x + m - 1) // m) * m


def _cdiv(a, b):
    return (a + b - 1) // b


def _sublane_pack(itemsize):
    """Sublane packing factor: f32 -> 8, bf16 -> 16, int8/fp8 -> 32."""
    return 8 * max(1, 4 // int(itemsize))


def _vmem_budget_and_limit():
    """(tile-picker budget, Mosaic vmem limit, per-block byte cap), per gen."""
    vmem_cap = None
    try:
        vmem_cap = getattr(pltpu.get_tpu_info(), "vmem_capacity_bytes", None)
    except Exception:
        vmem_cap = None
    if vmem_cap is None:
        vmem_cap = 64 * 1024 * 1024  # conservative: assume v7x (64 MiB / TC)
    if vmem_cap <= 64 * 1024 * 1024:  # v7x-like
        return 24 * 1024 * 1024, 32 * 1024 * 1024, 4 * 1024 * 1024
    # v5e / v6e: 128 MiB physical VMEM -> bigger tiles, fewer grid steps.
    return 48 * 1024 * 1024, 64 * 1024 * 1024, 8 * 1024 * 1024


def _pick_lane_tile(hw, max_lanes):
    """Lane (last-dim) tile: a multiple of 128, or the full hw when hw < 128."""
    if hw < 128:
        return hw
    max_lanes = max(128, (max_lanes // 128) * 128)
    return min(_round_up(hw, 128), max_lanes)


def _largest_divisor_tile(hw, cap):
    """Largest multiple of 128 that divides hw and is <= cap (hw % 128 == 0)."""
    cap = max(128, min(cap, hw))
    best = None
    t = 128
    while t <= cap:
        if hw % t == 0:
            best = t
        t += 128
    return best


def _ensure_two_parallel_steps(n, hw, t_n, t_hw, batch_quantum):
    """v7x megacore only helps if the parallel axes have >= 2 grid steps."""
    if _cdiv(n, t_n) * _cdiv(hw, t_hw) >= 2:
        return t_n, t_hw
    if hw >= 256:
        return t_n, _round_up(_cdiv(hw, 2), 128)
    if n >= 2 * batch_quantum:
        return _round_up(_cdiv(n, 2), batch_quantum), t_hw
    return t_n, t_hw  # too small to split usefully


# ---------------------------------------------------------------------------
# Kernels
# ---------------------------------------------------------------------------
def _lcm_per_channel_kernel(x1_ref, x2_ref, affine_ref, o_ref):
    """Small-C path: one channel per grid step.

    x1_ref/x2_ref: dense (t_n, t_hw) native-dtype tiles (no C padding).
    o_ref:         (t_n, t_hw) f32; doubles as the channel accumulator
                   (resident across the 'arbitrary' channel grid axis).
    affine_ref:    (2,) SMEM f32 = [-scale, -shift] of the folded eval BN.
    """
    ch = pl.program_id(2)
    # Multiply in the native input dtype, accumulate in f32 (VPU has bf16 on
    # v6e/v7x; v5e inserts the converts itself).
    prod = (x1_ref[...] * x2_ref[...]).astype(jnp.float32)

    @pl.when(ch == 0)
    def _():
        o_ref[...] = prod

    @pl.when(ch > 0)
    def _():
        o_ref[...] = o_ref[...] + prod

    @pl.when(ch == pl.num_programs(2) - 1)
    def _():
        # folded BatchNorm (eval) + "1 - sigmoid(z)" == "sigmoid(-z)"
        o_ref[...] = jax.nn.sigmoid(o_ref[...] * affine_ref[0] + affine_ref[1])


def _lcm_full_c_kernel(x1_ref, x2_ref, affine_ref, o_ref):
    """General path: all channels resident per step, sublane channel reduce.

    x1_ref/x2_ref: (t_n, C, t_hw) native-dtype tiles.
    o_ref:         (t_n, 1, t_hw) f32.  (Kept 3-D on this path: for C >= the
                   sublane pack the padded output block is a small VMEM
                   fraction and stores have huge slack in a DMA-bound kernel.)
    """
    prod = (x1_ref[...] * x2_ref[...]).astype(jnp.float32)
    dot = jnp.sum(prod, axis=1, keepdims=True)            # (t_n, 1, t_hw)
    o_ref[...] = jax.nn.sigmoid(dot * affine_ref[0] + affine_ref[1])


# ---------------------------------------------------------------------------
# pallas_call wrappers
# ---------------------------------------------------------------------------
def _pick_per_channel_tiles(n, hw, itemsize, pack_in, budget, max_block_bytes):
    """Tiles for the small-C path, or None if the general path should be used."""
    m_row = pack_in                      # keep rows a full sublane pack
    t_n0 = min(n, m_row)

    # double-buffered bytes per lane: 2 bufs x (2 inputs + f32 output)
    per_lane = 2 * (2 * t_n0 * itemsize + _round_up(t_n0, 8) * 4)
    max_lanes = min(budget // per_lane, max_block_bytes // (t_n0 * itemsize))
    t_hw = _largest_divisor_tile(hw, max_lanes)
    if t_hw is None or (t_hw != hw and t_hw < 512):
        return None                      # awkward factorization -> general path

    per_elem = 2 * (2 * itemsize + 4)    # bytes per (image, lane) element
    t_n_max = max(1, min(budget // (per_elem * t_hw),
                         max_block_bytes // (t_hw * itemsize)))
    if t_n_max >= n:
        t_n = n
    elif t_n_max >= m_row:
        t_n = (t_n_max // m_row) * m_row
    else:
        t_n = min(n, m_row)

    # Keep >= 2 steps on the parallel axes (v7x megacore) when splittable.
    if _cdiv(n, t_n) * (hw // t_hw) < 2:
        if hw >= 256:
            t_hw = _largest_divisor_tile(hw, hw // 2)
        elif n >= 2 * m_row:
            t_n = _round_up(_cdiv(n, 2), m_row)
    return t_n, t_hw


def _lcm_per_channel_call(x1m, x2m, affine, n, c, hw, t_n, t_hw, vmem_limit):
    # x1m/x2m: (N, C*HW) — channel-major, spatially contiguous columns
    # (a free reshape of the NCHW input), so channel ch / spatial block s maps
    # to column block ch * (HW // t_hw) + s.
    s_blocks = hw // t_hw
    grid = (_cdiv(n, t_n), s_blocks, c)

    in_spec = pl.BlockSpec((t_n, t_hw), lambda b, s, ch: (b, ch * s_blocks + s))
    return pl.pallas_call(
        _lcm_per_channel_kernel,
        out_shape=jax.ShapeDtypeStruct((n, hw), jnp.float32),
        grid_spec=pltpu.PrefetchScalarGridSpec(
            num_scalar_prefetch=0,
            grid=grid,
            in_specs=[
                in_spec,
                in_spec,
                pl.BlockSpec(memory_space=pltpu.SMEM),
            ],
            out_specs=pl.BlockSpec((t_n, t_hw), lambda b, s, ch: (b, s)),
        ),
        compiler_params=pltpu.CompilerParams(
            dimension_semantics=("parallel", "parallel", "arbitrary"),
            vmem_limit_bytes=vmem_limit,
        ),
    )(x1m, x2m, affine)


def _lcm_general_call(x1f, x2f, affine, n, c, hw, itemsize, pack_in,
                      budget, vmem_limit, max_block_bytes):
    # Padded-aware, double-buffered VMEM accounting:
    #   inputs: 2 bufs x 2 arrays x t_n x c_pad x t_hw x itemsize
    #   output: 2 bufs x t_n x 8 (padded unit sublane) x t_hw x 4
    c_pad = _round_up(c, pack_in)
    per_lane = 4 * c_pad * itemsize + 64          # per (image, lane)
    max_lanes = min(budget // per_lane, max_block_bytes // (c_pad * itemsize))
    t_hw = _pick_lane_tile(hw, max_lanes)

    t_n_max = min(budget // (per_lane * t_hw),
                  max_block_bytes // max(1, c_pad * itemsize * t_hw))
    t_n = max(1, min(n, t_n_max))
    t_n, t_hw = _ensure_two_parallel_steps(n, hw, t_n, t_hw, 1)
    grid = (_cdiv(n, t_n), _cdiv(hw, t_hw))

    return pl.pallas_call(
        _lcm_full_c_kernel,
        out_shape=jax.ShapeDtypeStruct((n, 1, hw), jnp.float32),
        grid_spec=pltpu.PrefetchScalarGridSpec(
            num_scalar_prefetch=0,
            grid=grid,
            in_specs=[
                pl.BlockSpec((t_n, c, t_hw), lambda b, s: (b, 0, s)),
                pl.BlockSpec((t_n, c, t_hw), lambda b, s: (b, 0, s)),
                pl.BlockSpec(memory_space=pltpu.SMEM),
            ],
            out_specs=pl.BlockSpec((t_n, 1, t_hw), lambda b, s: (b, 0, s)),
        ),
        compiler_params=pltpu.CompilerParams(
            dimension_semantics=("parallel", "parallel"),
            vmem_limit_bytes=vmem_limit,
        ),
    )(x1f, x2f, affine)


# ---------------------------------------------------------------------------
# Public forward
# ---------------------------------------------------------------------------
def lcm_forward(x1, x2, gamma, beta, running_mean, running_var, eps=1e-5):
    n, c, h, w = x1.shape
    hw = h * w
    x2 = x2.astype(x1.dtype)
    itemsize = jnp.dtype(x1.dtype).itemsize
    pack_in = _sublane_pack(itemsize)
    budget, vmem_limit, max_block_bytes = _vmem_budget_and_limit()

    # Folded eval-mode BatchNorm with the "1 - sigmoid" sign flip:
    #   1 - sigmoid(dot*scale + shift) == sigmoid(dot*(-scale) + (-shift))
    inv_std = 1.0 / jnp.sqrt(running_var.astype(jnp.float32) + eps)
    scale = gamma.astype(jnp.float32) * inv_std
    shift = beta.astype(jnp.float32) - running_mean.astype(jnp.float32) * scale
    affine = jnp.concatenate([(-scale).reshape(1), (-shift).reshape(1)])

    tiles = None
    if c < pack_in and hw % 128 == 0:
        tiles = _pick_per_channel_tiles(n, hw, itemsize, pack_in, budget,
                                        max_block_bytes)
    if tiles is not None:
        t_n, t_hw = tiles
        out2d = _lcm_per_channel_call(
            x1.reshape(n, c * hw), x2.reshape(n, c * hw), affine,
            n, c, hw, t_n, t_hw, vmem_limit)
        return out2d.reshape(n, 1, h, w)

    out3d = _lcm_general_call(
        x1.reshape(n, c, hw), x2.reshape(n, c, hw), affine,
        n, c, hw, itemsize, pack_in, budget, vmem_limit, max_block_bytes)
    return out3d.reshape(n, 1, h, w)


# ---------------------------------------------------------------------------
# Pure-JAX reference (eval-mode BatchNorm), mirroring the PyTorch forward.
# ---------------------------------------------------------------------------
def lcm_reference(x1, x2, gamma, beta, running_mean, running_var, eps=1e-5):
    dot = jnp.sum(x1.astype(jnp.float32) * x2.astype(jnp.float32), axis=1,
                  keepdims=True)                     # (N, 1, H, W)
    normed = (dot - running_mean) / jnp.sqrt(running_var + eps) * gamma + beta
    return 1.0 - jax.nn.sigmoid(normed)


if __name__ == "__main__":
    key = jax.random.PRNGKey(0)
    k1, k2 = jax.random.split(key)

    N, C, H, W = 2, 4, 16, 16
    x1 = jax.random.normal(k1, (N, C, H, W), dtype=jnp.float32)
    x2 = jax.random.normal(k2, (N, C, H, W), dtype=jnp.float32)

    # nn.BatchNorm2d(1) parameters right after __init__ (PyTorch defaults).
    gamma = jnp.ones((1,), jnp.float32)
    beta = jnp.zeros((1,), jnp.float32)
    running_mean = jnp.zeros((1,), jnp.float32)
    running_var = jnp.ones((1,), jnp.float32)

    out = lcm_forward(x1, x2, gamma, beta, running_mean, running_var)
    out = jax.block_until_ready(out)

    ref = lcm_reference(x1, x2, gamma, beta, running_mean, running_var)
    assert out.shape == (N, 1, H, W), out.shape
    assert jnp.allclose(out, ref, atol=1e-5, rtol=1e-5), "mismatch vs reference"

    print("KERNEL_OK")
</pallas_src>

<mosaic_0001>
module attributes {stable_mosaic.version = 11 : i64} {
  func.func @_lcm_per_channel_kernel(%arg0: i32, %arg1: i32, %arg2: i32, %arg3: memref<2x128xf32, #tpu.memory_space<vmem>>, %arg4: memref<2x128xf32, #tpu.memory_space<vmem>>, %arg5: memref<2xf32, #tpu.memory_space<smem>>, %arg6: memref<2x128xf32, #tpu.memory_space<vmem>>) attributes {dimension_semantics = [#tpu.dimension_semantics<parallel>, #tpu.dimension_semantics<parallel>, #tpu.dimension_semantics<arbitrary>], iteration_bounds = array<i64: 1, 2, 4>, scalar_prefetch = 0 : i64, scratch_operands = 0 : i64, tpu.core_type = #tpu.core_type<tc>, window_params = [{transform_indices = @transform_0, window_bounds = array<i64: 2, 128>}, {transform_indices = @transform_1, window_bounds = array<i64: 2, 128>}, {transform_indices = @transform_2, window_bounds = array<i64: 2>}, {transform_indices = @transform_3, window_bounds = array<i64: 2, 128>}]} {
    %c0 = arith.constant 0 : index
    %c0_0 = arith.constant 0 : index
    %0 = vector.load %arg3[%c0, %c0_0] : memref<2x128xf32, #tpu.memory_space<vmem>>, vector<2x128xf32>
    %c0_1 = arith.constant 0 : index
    %c0_2 = arith.constant 0 : index
    %1 = vector.load %arg4[%c0_1, %c0_2] : memref<2x128xf32, #tpu.memory_space<vmem>>, vector<2x128xf32>
    %2 = arith.mulf %0, %1 : vector<2x128xf32>
    %c0_i32 = arith.constant 0 : i32
    %3 = arith.cmpi eq, %arg2, %c0_i32 : i32
    %4 = arith.extui %3 : i1 to i32
    %c0_i32_3 = arith.constant 0 : i32
    %5 = arith.cmpi ne, %4, %c0_i32_3 : i32
    scf.if %5 {
      %c0_7 = arith.constant 0 : index
      %c0_8 = arith.constant 0 : index
      %12 = vector.load %arg6[%c0_7, %c0_8] : memref<2x128xf32, #tpu.memory_space<vmem>>, vector<2x128xf32>
      tpu.vector_store %arg6[%c0_7, %c0_8], %2 {strides = array<i32>} : memref<2x128xf32, #tpu.memory_space<vmem>>, vector<2x128xf32>,
    } else {
    }
    %c0_i32_4 = arith.constant 0 : i32
    %6 = arith.cmpi sgt, %arg2, %c0_i32_4 : i32
    %7 = arith.extui %6 : i1 to i32
    %c0_i32_5 = arith.constant 0 : i32
    %8 = arith.cmpi ne, %7, %c0_i32_5 : i32
    scf.if %8 {
      %c0_7 = arith.constant 0 : index
      %c0_8 = arith.constant 0 : index
      %12 = vector.load %arg6[%c0_7, %c0_8] : memref<2x128xf32, #tpu.memory_space<vmem>>, vector<2x128xf32>
      %13 = arith.addf %12, %2 : vector<2x128xf32>
      %c0_9 = arith.constant 0 : index
      %c0_10 = arith.constant 0 : index
      %14 = vector.load %arg6[%c0_9, %c0_10] : memref<2x128xf32, #tpu.memory_space<vmem>>, vector<2x128xf32>
      tpu.vector_store %arg6[%c0_9, %c0_10], %13 {strides = array<i32>} : memref<2x128xf32, #tpu.memory_space<vmem>>, vector<2x128xf32>,
    } else {
    }
    %c3_i32 = arith.constant 3 : i32
    %9 = arith.cmpi eq, %arg2, %c3_i32 : i32
    %10 = arith.extui %9 : i1 to i32
    %c0_i32_6 = arith.constant 0 : i32
    %11 = arith.cmpi ne, %10, %c0_i32_6 : i32
    scf.if %11 {
      %c0_7 = arith.constant 0 : index
      %c0_8 = arith.constant 0 : index
      %12 = vector.load %arg6[%c0_7, %c0_8] : memref<2x128xf32, #tpu.memory_space<vmem>>, vector<2x128xf32>
      %c0_9 = arith.constant 0 : index
      %13 = memref.load %arg5[%c0_9] : memref<2xf32, #tpu.memory_space<smem>>
      %14 = vector.broadcast %13 : f32 to vector<2x128xf32>
      %15 = arith.mulf %12, %14 : vector<2x128xf32>
      %c1 = arith.constant 1 : index
      %16 = memref.load %arg5[%c1] : memref<2xf32, #tpu.memory_space<smem>>
      %17 = vector.broadcast %16 : f32 to vector<2x128xf32>
      %18 = arith.addf %15, %17 : vector<2x128xf32>
      %19 = arith.negf %18 : vector<2x128xf32>
      %20 = math.exp %19 : vector<2x128xf32>
      %cst = arith.constant 1.000000e+00 : f32
      %21 = vector.broadcast %cst : f32 to vector<2x128xf32>
      %22 = arith.addf %21, %20 : vector<2x128xf32>
      %23 = arith.divf %21, %22 : vector<2x128xf32>
      %c0_10 = arith.constant 0 : index
      %c0_11 = arith.constant 0 : index
      %24 = vector.load %arg6[%c0_10, %c0_11] : memref<2x128xf32, #tpu.memory_space<vmem>>, vector<2x128xf32>
      tpu.vector_store %arg6[%c0_10, %c0_11], %23 {strides = array<i32>} : memref<2x128xf32, #tpu.memory_space<vmem>>, vector<2x128xf32>,
    } else {
    }
    return
  }
  func.func @transform_0(%arg0: i32, %arg1: i32, %arg2: i32) -> (i32, i32) {
    %c2_i32 = arith.constant 2 : i32
    %0 = arith.muli %arg2, %c2_i32 : i32
    %1 = arith.addi %0, %arg1 : i32
    %c0_i32 = arith.constant 0 : i32
    return %arg0, %1 : i32, i32
  }
  func.func @transform_1(%arg0: i32, %arg1: i32, %arg2: i32) -> (i32, i32) {
    %c2_i32 = arith.constant 2 : i32
    %0 = arith.muli %arg2, %c2_i32 : i32
    %1 = arith.addi %0, %arg1 : i32
    %c0_i32 = arith.constant 0 : i32
    return %arg0, %1 : i32, i32
  }
  func.func @transform_2(%arg0: i32, %arg1: i32, %arg2: i32) -> i32 {
    %c0_i32 = arith.constant 0 : i32
    %c0_i32_0 = arith.constant 0 : i32
    return %c0_i32 : i32
  }
  func.func @transform_3(%arg0: i32, %arg1: i32, %arg2: i32) -> (i32, i32) {
    %c0_i32 = arith.constant 0 : i32
    return %arg0, %arg1 : i32, i32
  }
}

</mosaic_0001>

<bundles_post_ra>
// kernel: tpu_custom_call.1
= control target key start
LH: loop header
LB: loop body
LE: loop exit
PB: predicated region body
PF: predicated region fallthrough
CT: control target
= control target key end

     0   :  { %s1076_s0 = inlined_call_operand.hbm [shape: f32[2,1024], index: 0, kind: input, shape index: {}]   ;;  %s1077_s1 = inlined_call_operand.hbm [shape: f32[2,1024], index: 1, kind: input, shape index: {}]   ;;  %s1078_s2 = inlined_call_operand.vmem [shape: f32[2], index: 2, kind: input, shape index: {}]   ;;  %s1079_s3 = inlined_call_operand.hbm [shape: f32[2,256], index: 3, kind: output, shape index: {}]  }
   0x1   :  { %1087 = sst [smem:[#allocation20_spill]] %s1076_s0 }
   0x2   :  { %1088 = sst [smem:[#allocation21_spill]] %s1078_s2 }
   0x3   :  { %1089 = sst [smem:[#allocation22_spill]] %s1079_s3 }
   0x4   :  { %8 = vsyncpa [#allocation3], 0 }
   0x5   :  { %10 = vsyncpa [#allocation3 + $0x1], 0 }
   0x6   :  { %11 = vsyncpa [#allocation7], 0 }
   0x7   :  { %13 = vsyncpa [#allocation7 + $0x1], 0 }
   0x8   :  { %14 = vsyncpa [#allocation5], 0 }
   0x9   :  { %15 = vsyncpa [#allocation4], 0 }
   0xa   :  { %17 = vsyncpa [#allocation4 + $0x1], 0  ;;  %s836_s12 = smov 0   ;;  %s838_s13 = smov 0  }
   0xb   :  { %s840_s14 = smov 0   ;;  %s842_s15 = smov 0  }
   0xc   :  { %s844_s16 = smov 0   ;;  %s846_s17 = smov 0  }
   0xd   :  { %s848_s18 = smov 0   ;;  %s850_s19 = smov 0  }
   0xe   :  { %s852_s20 = smov 0   ;;  %s854_s21 = smov 0  }
   0xf   :  { %s856_s22 = smov 0  }
  0x10 LB: > { %1090 = sst [smem:[#allocation14_spill]] %s770_s12  ;;  %s460_s23 = sadd.s32 4294967295, %s810_s22   ;;  %s810_s22 = sphi %s856_s22, %s23_s22   ;;  %s806_s21 = sphi %s854_s21, %s1120_s21   ;;  %s802_s20 = sphi %s852_s20, %s1112_s20   ;;  %s798_s19 = sphi %s850_s19, %s1119_s19   ;;  %s794_s18 = sphi %s848_s18, %s1111_s18   ;;  %s790_s17 = sphi %s846_s17, %s1118_s17   ;;  %s786_s16 = sphi %s844_s16, %s1117_s16   ;;  %s782_s15 = sphi %s842_s15, %s1116_s15   ;;  %s778_s14 = sphi %s840_s14, %s1115_s14   ;;  %s774_s13 = sphi %s838_s13, %s1114_s13   ;;  %s770_s12 = sphi %s836_s12, %s1113_s12  }
  0x11   : > { %1091 = sst [smem:[#allocation15_spill]] %s798_s19  ;;  %s461_s24 = sadd.s32 4294967294, %s810_s22  }
  0x12   : > { %1092 = sst [smem:[#allocation16_spill]] %s802_s20  ;;  %p68_p0 = scmp.ne.s32.totalorder %s786_s16, %s782_s15 }
  0x13   : > { %p892_p1 = scmp.eq.s32.totalorder %s460_s23, 0  ;;  %p146_p2 = scmp.ne.s32.totalorder %s778_s14, %s774_s13 }
  0x14   : > { %p147_p3 = scmp.eq.s32.totalorder %s460_s23, 7  ;;  %p152_p5 = scmp.ne.s32.totalorder %s774_s13, %s770_s12 }
  0x15   : > { %p900_p4 = por %p892_p1, %p68_p0  ;;  %p153_p7 = scmp.eq.s32.totalorder %s461_s24, 7 }
  0x16   : > { %p906_p6 = por %p147_p3, %p146_p2  ;;  %p466_p8 = scmp.ge.s32.totalorder %s810_s22, 1 }
  0x17   : > { %p160_p9 = scmp.lt.s32.totalorder %s810_s22, 9  ;;  %p912_p10 = por %p153_p7, %p152_p5 }
  0x18   : > { %s1095_s27 = scalar_select %p906_p6, 1, 0 }
  0x19   : > { %s1097_s28 = scalar_select %p912_p10, 1, 0 }
  0x1a   : > { %1096 = sst [smem:[#allocation17_spill]] %s1095_s27  ;;  %p916_p11 = pnand %p466_p8, %p160_p9 }
  0x1b   : > { %1098 = sst [smem:[#allocation18_spill]] %s1097_s28 }
  0x1c   : > { %s1100_s2 = sld [smem:[#allocation21_spill]]  ;;  %p499_p12 = pneg %p916_p11 }
  0x1e   : > { %p500_p13 = pnand %p499_p12, %p892_p1 }
  0x20   : > { %p613_p2 = pneg %p500_p13 }
  0x22   : > { %s173_s5 = sshll.u32 %s1100_s2, 4  ;;  %s174_s5 = int_to_ptr.vmem [resolvable:$true] %s173_s5 }
  0x23   : > { %s611_s6 = scalar_lea.vmem %s174_s5, 16  ;;  %p619_p7 = scmp.lt.s32.totalorder %s174_s5, %s174_s5 }
  0x24   : > { %p612_p0 = scmp.ne.s32.totalorder %s174_s5, %s611_s6  ;;  %p620_p8 = scmp.lt.s32.totalorder %s611_s6, %s611_s6 }
  0x26   : > { %p614_p3 = pnand %p613_p2, %p612_p0  ;;  %p621_p9 = por %p620_p8, %p619_p7 }
  0x28   : > { %p615_p5 = pneg %p614_p3 }
  0x2a   : > { %p622_p10 = pnand %p621_p9, %p615_p5 }
  0x2c   : > { %625 = shalt.err (!%p622_p10)
}
  0x2d   : > { %s812_s7 = smov [#allocation8]   ;;  %s35_s8 = sadd.s32 1, %s802_s20 }
  0x2e   : > { %502 = dma.vmem_to_smem (!%p500_p13), %s174_s5, 16, %s812_s7, [#allocation5]  }
  0x2f   : > { %s38_s9 = sadd.s32 1, %s806_s21  ;;  %p36_p12 = scmp.ge.s32.totalorder %s35_s8, 4 }
  0x30   : > { %s462_s10 = sshll.u32 %s802_s20, 1  ;;  %s55_s15 = sadd.s32 1, %s790_s17 }
  0x31   : > { %s931_s11 = sadd.s32 %s806_s21, %s462_s10  ;;  %s1122_s8 = smov (%p36_p12, %s35_s8), 0 }
  0x32   : > { %1101 = sst [smem:[#allocation19_spill]] %s1122_s8  ;;  %s1124_s9 = smov (!%p36_p12, %s38_s9), %s806_s21 }
  0x33   : > { %s463_s23 = sshll.u32 %s1122_s8, 1  ;;  %p62_p10 = scmp.ne.s32.totalorder %s790_s17, %s786_s16 }
  0x34   : > { %p40_p13 = scmp.ge.s32.totalorder %s1124_s9, 2  ;;  %p63_p0 = scmp.eq.s32.totalorder %s810_s22, 0 }
  0x35   : > { %s136_s24 = sadd.s32 1, %s778_s14  ;;  %p515_p2 = scmp.lt.s32.totalorder %s810_s22, 8 }
  0x36   : > { %s1126_s9 = smov (%p40_p13, %s1124_s9), 0  ;;  %p945_p3 = por %p63_p0, %p62_p10 }
  0x37   : > { %s950_s4 = sand.u32 1, %s790_s17   ;;  %s49_s5 = sadd.s32 %s463_s23, %s1126_s9 }
  0x38   : > { %s132_s6 = ssub.s32 %s806_s21, %s1126_s9  ;;  %s51_s7 = ssub.s32 %s931_s11, %s49_s5 }
  0x39   : > { %p134_p5 = scmp.eq.s32.totalorder %s132_s6, 0  ;;  %p53_p7 = scmp.eq.s32.totalorder %s51_s7, 0 }
  0x3a   : > { %s469_s8 = sshll.u32 %s950_s4, 1  ;;  %s471_s20 = sshll.u32 %s931_s11, 5 }
  0x3b   : > { %s957_s10 = scalar_select %p134_p5, %s778_s14, %s136_s24  }
  0x3c   : > { %s960_s2 = scalar_select %p53_p7, %s790_s17, %s55_s15  }
  0x3d   : > { %s1103_s0 = sld [smem:[#allocation20_spill]]  ;;  %s188_s27 = scalar_lea.vmem [#allocation2], %s469_s8 }
  0x3e   : > { %s199_s19 = sshll.u32 %s188_s27, 4  ;;  %p971_p8 = pnand %p515_p2, %p945_p3  ;;  %s200_s19 = int_to_ptr.vmem [resolvable:$true] %s199_s19 }
  0x3f   : > { %s185_s24 = scalar_lea.sflag [#allocation3], %s950_s4  ;;  %s639_s15 = scalar_lea.vmem %s200_s19, 32 }
  0x40   : > { %p628_p9 = pneg %p971_p8  ;;  %p640_p12 = scmp.ne.s32.totalorder %s200_s19, %s639_s15 }
  0x41   : > { %s813_s12 = smov [#allocation2]  }
  0x42   : > { %p642_p10 = pnand %p640_p12, %p628_p9  ;;  %s644_s27 = sshll.u32 %s813_s12, 4  ;;  %s645_s27 = int_to_ptr.vmem [resolvable:$false] %s644_s27 }
  0x43   : > { %s197_s3 = scalar_lea.hbm %s1103_s0, %s471_s20  ;;  %s646_s28 = scalar_lea.vmem %s645_s27, 64 }
  0x44   : > { %p643_p13 = pneg %p642_p10  ;;  %p647_p0 = scmp.lt.s32.totalorder %s200_s19, %s645_s27 }
  0x45   : > { %p648_p2 = scmp.lt.s32.totalorder %s646_s28, %s639_s15 }
  0x47   : > { %p649_p3 = por %p648_p2, %p647_p0 }
  0x49   : > { %p650_p5 = pnand %p649_p3, %p643_p13 }
  0x4b   : > { %653 = shalt.err (!%p650_p5)
}
  0x4c   : > { %506 = dma.hbm_to_vmem [thread:$0]  (!%p971_p8), %s197_s3, 32, %s200_s19, %s185_s24  }
  0x4d   : > { %s219_s5 = scalar_lea.hbm %s1077_s1, %s471_s20  ;;  %s210_s6 = scalar_lea.vmem [#allocation6], %s469_s8 }
  0x4e   : > { %s221_s7 = sshll.u32 %s210_s6, 4  ;;  %s207_s12 = scalar_lea.sflag [#allocation7], %s950_s4  ;;  %s222_s7 = int_to_ptr.vmem [resolvable:$true] %s221_s7 }
  0x4f   : > { %s667_s0 = scalar_lea.vmem %s222_s7, 32  ;;  %s814_s15 = smov [#allocation6]  }
  0x50   : > { %p668_p7 = scmp.ne.s32.totalorder %s222_s7, %s667_s0  ;;  %s672_s27 = sshll.u32 %s814_s15, 4  ;;  %s673_s27 = int_to_ptr.vmem [resolvable:$false] %s672_s27 }
  0x51   : > { %s674_s28 = scalar_lea.vmem %s673_s27, 64  ;;  %p675_p13 = scmp.lt.s32.totalorder %s222_s7, %s673_s27 }
  0x52   : > { %p670_p12 = pnand %p668_p7, %p628_p9  ;;  %p676_p0 = scmp.lt.s32.totalorder %s674_s28, %s667_s0 }
  0x54   : > { %p671_p10 = pneg %p670_p12  ;;  %p677_p2 = por %p676_p0, %p675_p13 }
  0x56   : > { %p678_p3 = pnand %p677_p2, %p671_p10 }
  0x58   : > { %681 = shalt.err (!%p678_p3)
}
  0x59   : > { %509 = dma.hbm_to_vmem [thread:$0]  (!%p971_p8), %s219_s5, 32, %s222_s7, %s207_s12  }
  0x5a   : > { %230 = sbr.rel (%p916_p11) target bundleno = 190 (0xbe), region = 32  ;;  %s232_s3 = sand.u32 (!%p916_p11), 1, %s786_s16  }
  0x5b   : > { %s476_s19 = sshll.u32 (!%p916_p11), %s232_s3, 1  ;;  %s233_s20 = scalar_lea.sflag (!%p916_p11), [#allocation3], %s232_s3 }
  0x5c   : > { %s236_s8 = scalar_lea.vmem (!%p916_p11), [#allocation2], %s476_s19 }
  0x5f   : > { %753 = dma.done.wait (%p900_p4), %s233_s20, 32  }
  0x60   : > { %755 = vsyncadd (%p900_p4), %s233_s20, 4294967264  ;;  %s242_s0 = scalar_lea.sflag [#allocation7], %s232_s3  ;;  %s245_s4 = scalar_lea.vmem [#allocation6], %s476_s19 }
  0x61   : > { %757 = dma.done.wait (%p900_p4), %s242_s0, 32  }
  0x62   : > { %759 = vsyncadd (%p900_p4), %s242_s0, 4294967264 }
  0x63   : > { %761 = dma.done.wait (%p892_p1), [#allocation5], 16  }
  0x64   : > { %763 = vsyncadd (%p892_p1), [#allocation5], 4294967280 }
  0x65   : > { %254 = sfence }
  0x66   : > { %s275_s29 = sand.u32 1, %s774_s13   ;;  %v282_v0 = vld [vmem:[%s236_s8] sm:$0x3]  ;;  %v283_v1 = vld [vmem:[%s245_s4] sm:$0x3]  ;;  %p480_p11 = scmp.ne.s32.totalorder %s794_s18, 0 }
  0x67   : > { %s479_s23 = sshll.u32 %s275_s29, 1  ;;  %v284_v2 = vmul.f32 %v283_v1, %v282_v0 }
  0x68   : > { %s1010_s24 = scalar_lea.vmem [#allocation9], %s479_s23  ;;  %288 = sbr.rel (%p480_p11) target bundleno = 110 (0x6e), region = 48 }
  0x6d   : > { %289 = vst [vmem:[%s1010_s24] sm:$0x3] %v284_v2 }
  0x6e PF: > { %p481_p4 = scmp.le.s32.totalorder %s794_s18, 0 }
  0x70   : > { %293 = sbr.rel (%p481_p4) target bundleno = 121 (0x79), region = 52 }
  0x75   : > { %v294_v3 = vld [vmem:[%s1010_s24] sm:$0x3] }
  0x76   : > { %v295_v4 = vadd.f32 %v294_v3, %v284_v2 }
  0x78   : > { %296 = vst [vmem:[%s1010_s24] sm:$0x3] %v295_v4 }
  0x79 PF: > { %p482_p1 = scmp.ne.s32.totalorder %s794_s18, 3 }
  0x7a   : > { %s302_s25 = sld [smem:[#allocation8]] (!%p482_p1) }
  0x7b   : > { %300 = sbr.rel (%p482_p1) target bundleno = 166 (0xa6), region = 56  ;;  %s483_s26 = sld [smem:[#allocation8 + $0x1]] (!%p482_p1) }
  0x80   : > { %v301_v5 = vld [vmem:[%s1010_s24] sm:$0x3]  ;;  %v303_v6 = vstv %s302_s25 }
  0x81   : > { %v304_v7 = vmul.f32 %v303_v6, %v301_v5  ;;  %v306_v8 = vstv %s483_s26 }
  0x83   : > { %v307_v9 = vadd.f32 %v306_v8, %v304_v7 }
  0x85   : > { %v484_v10 = vmul.f32 -1.442695, %v307_v9 }
  0x87   : > { %607 = vpow2.f32 %v484_v10 }
  0x94   : > { %v608_v11 = vpop.eup %607 }
  0x95   : > { %v311_v12 = vadd.f32 1.0, %v608_v11 }
  0x97   : > { %609 = vrcp.f32 %v311_v12 }
  0xa4   : > { %v610_v13 = vpop.eup %609 }
  0xa5   : > { %314 = vst [vmem:[%s1010_s24] sm:$0x3] %v610_v13 }
  0xa6 PF: > { %s1105_s11 = sld [smem:[#allocation15_spill]]  ;;  %s331_s15 = sshll.u32 %s1010_s24, 4  ;;  %s332_s15 = int_to_ptr.vmem [resolvable:$true] %s331_s15 }
  0xa7   : > { %s1107_s7 = sld [smem:[#allocation22_spill]]  ;;  %s316_s27 = scalar_lea.sflag [#allocation4], %s275_s29 }
  0xa8   : > { %s682_s28 = scalar_lea.vmem %s332_s15, 32  ;;  %s815_s3 = smov [#allocation9]  }
  0xa9   : > { %p683_p8 = scmp.ne.s32.totalorder %s332_s15, %s682_s28  ;;  %s686_s19 = sshll.u32 %s815_s3, 4  ;;  %s687_s19 = int_to_ptr.vmem [resolvable:$false] %s686_s19 }
  0xaa   : > { %s688_s20 = scalar_lea.vmem %s687_s19, 64  ;;  %p689_p7 = scmp.lt.s32.totalorder %s332_s15, %s687_s19 }
  0xab   : > { %p684_p9 = pnand %p683_p8, %p906_p6  ;;  %p690_p12 = scmp.lt.s32.totalorder %s688_s20, %s682_s28 }
  0xac   : > { %s486_s30 = sshll.u32 %s1105_s11, 5 }
  0xad   : > { %s329_s12 = scalar_lea.hbm %s1107_s7, %s486_s30  ;;  %p685_p5 = pneg %p684_p9 }
  0xae   : > { %p691_p10 = por %p690_p12, %p689_p7 }
  0xb0   : > { %p692_p13 = pnand %p691_p10, %p685_p5 }
  0xb2   : > { %695 = shalt.err (!%p692_p13)
}
  0xb3   : > { %s696_s8 = scalar_lea.hbm %s329_s12, 32  ;;  %s700_s29 = scalar_lea.hbm %s1107_s7, 64 }
  0xb4   : > { %p697_p0 = scmp.ne.s32.totalorder %s329_s12, %s696_s8  ;;  %p701_p11 = scmp.lt.s32.totalorder %s329_s12, %s1107_s7 }
  0xb5   : > { %p702_p4 = scmp.lt.s32.totalorder %s700_s29, %s696_s8 }
  0xb6   : > { %p698_p2 = pnand %p697_p0, %p906_p6 }
  0xb7   : > { %p703_p1 = por %p702_p4, %p701_p11 }
  0xb8   : > { %p699_p3 = pneg %p698_p2 }
  0xba   : > { %p704_p8 = pnand %p703_p1, %p699_p3 }
  0xbc   : > { %707 = shalt.err (!%p704_p8)
}
  0xbd   : > { %497 = dma.vmem_to_hbm [thread:$0]  (%p906_p6), %s332_s15, 32, %s329_s12, %s316_s27  }
  0xbe PF: > { %s1108_s25 = sld [smem:[#allocation14_spill]]  ;;  %p517_p9 = scmp.ge.s32.totalorder %s810_s22, 2 }
  0xbf   : > { %s1109_s26 = sld [smem:[#allocation18_spill]] }
  0xc4   : > { %s343_s11 = sand.u32 1, %s1108_s25  }
  0xc5   : > { %p1110_p5 = scmp.ne.s32.totalorder %s1109_s26, 0  ;;  %s344_s30 = scalar_lea.sflag [#allocation4], %s343_s11 }
  0xc7   : > { %p511_p7 = pnand %p517_p9, %p1110_p5 }
  0xc9   : > { %p512_p12 = pneg %p511_p7 }
  0xcb   : > { %765 = dma.done.wait (%p512_p12), %s344_s30, 32  }
  0xcc   : > { %767 = vsyncadd (%p512_p12), %s344_s30, 4294967264  ;;  %s23_s22 = sadd.s32 1, %s810_s22   ;;  %s1111_s18 = sld [smem:[#allocation16_spill]] }
  0xcd   : > { %p20_p10 = scmp.ge.s32.totalorder %s23_s22, 10   ;;  %s1112_s20 = sld [smem:[#allocation19_spill]] }
  0xce   : > { %s1113_s12 = smov %s774_s13  ;;  %s1114_s13 = smov %s778_s14 }
  0xcf   : > { %s1115_s14 = smov %s957_s10  ;;  %s1116_s15 = smov %s786_s16 }
  0xd0   : > { %s1117_s16 = smov %s790_s17  ;;  %s1118_s17 = smov %s960_s2 }
  0xd1   : > { %s1119_s19 = smov %s806_s21  ;;  %s1120_s21 = smov %s1126_s9 }
  0xd2   :  { %22 = sbr.rel (!%p20_p10) target bundleno = 16 (0x10), region = 107 }
  0xd7   :  { %349 = vsyncpa [#allocation3], 1 }
  0xd8   :  { %351 = vsyncpa [#allocation3 + $0x1], 1 }
  0xd9   :  { %352 = vsyncpa [#allocation7], 1 }
  0xda   :  { %354 = vsyncpa [#allocation7 + $0x1], 1 }
  0xdb   :  { %355 = vsyncpa [#allocation4], 1 }
  0xdc   :  { %357 = vsyncpa [#allocation4 + $0x1], 1 }
  0xdd   :  { %358 = vsyncpa [#allocation5], 1 }
  0xde   :  { %360 = vsyncpa [#allocation5 + $0x1], 1 }

</bundles_post_ra>
